<compile_context>
chip_gen: v6e
topology: v6e:2x2x1
jax: 0.10.0
libtpu: 0.0.40
codegen_flags: <defaults>
</compile_context>

<pallas_src>
import jax
import jax.numpy as jnp
from jax import lax
from jax.experimental import pallas as pl
from jax.experimental.pallas import tpu as pltpu

HIDDEN = 512


def head_kernel(x_ref, w1_ref, b1_ref, w2_ref, b2_ref, o_ref, acc_ref):
    # x_ref : (bm, tk)        bf16 flattened activation chunk
    # w1_ref: (512, tk)       bf16 first Linear weight chunk (PyTorch layout)
    # b1_ref: (1, 512)        f32 first Linear bias
    # w2_ref: (out_f, 512)    bf16 second Linear weight (PyTorch layout)
    # b2_ref: (1, out_f)      f32 second Linear bias
    # o_ref : (bm, out_f)     f32 output
    # acc_ref: (bm, 512)      f32 VMEM accumulator for the first GEMM
    k = pl.program_id(1)

    @pl.when(k == 0)
    def _():
        acc_ref[...] = jnp.zeros_like(acc_ref)

    # Partial x @ W1.T: contract dim 1 of x against dim 1 of W1 (no transpose).
    acc_ref[...] += lax.dot_general(
        x_ref[...], w1_ref[...],
        dimension_numbers=(((1,), (1,)), ((), ())),
        preferred_element_type=jnp.float32)

    @pl.when(k == pl.num_programs(1) - 1)
    def _():
        # bias + ReLU, then Linear(512, out_f): h @ W2.T + b2 (again transpose-free)
        h = jnp.maximum(acc_ref[...] + b1_ref[...], 0.0)
        o = lax.dot_general(
            h.astype(w2_ref.dtype), w2_ref[...],
            dimension_numbers=(((1,), (1,)), ((), ())),
            preferred_element_type=jnp.float32)
        o_ref[...] = (o + b2_ref[...]).astype(o_ref.dtype)


def head_forward(x_nchw, w1, b1, w2, b2, *, tk=512):
    """Runs the Head forward pass. x_nchw: (N, C, H, W) float32."""
    n = x_nchw.shape[0]
    in_f = int(x_nchw.size // n)
    x = x_nchw.reshape(n, in_f)                     # nn.Flatten()
    out_f = w2.shape[0]

    # bf16 operands (halve weight-DMA bytes, native MXU bf16 path); f32 biases
    # and f32 in-kernel accumulation preserve accuracy.
    x_bf = x.astype(jnp.bfloat16)
    w1_bf = w1.astype(jnp.bfloat16)
    w2_bf = w2.astype(jnp.bfloat16)
    b1_2d = b1.reshape(1, HIDDEN).astype(jnp.float32)
    b2_2d = b2.reshape(1, out_f).astype(jnp.float32)

    # K-tile the in_f contraction; zero-pad K to a multiple of tk (zeros are a
    # no-op for the matmul).  tk=512 keeps the per-step W1 tile at 512 KiB bf16.
    tk = min(tk, in_f)
    k_pad = (-in_f) % tk
    if k_pad:
        x_bf = jnp.pad(x_bf, ((0, 0), (0, k_pad)))
        w1_bf = jnp.pad(w1_bf, ((0, 0), (0, k_pad)))
    nk = (in_f + k_pad) // tk

    return pl.pallas_call(
        head_kernel,
        out_shape=jax.ShapeDtypeStruct((n, out_f), jnp.float32),
        grid=(1, nk),   # (batch tiles, K tiles) — reduction axis last
        in_specs=[
            pl.BlockSpec((n, tk),          lambda i, k: (i, k)),
            pl.BlockSpec((HIDDEN, tk),     lambda i, k: (0, k)),
            pl.BlockSpec((1, HIDDEN),      lambda i, k: (0, 0)),
            pl.BlockSpec((out_f, HIDDEN),  lambda i, k: (0, 0)),
            pl.BlockSpec((1, out_f),       lambda i, k: (0, 0)),
        ],
        out_specs=pl.BlockSpec((n, out_f), lambda i, k: (i, 0)),
        scratch_shapes=[pltpu.VMEM((n, HIDDEN), jnp.float32)],
        compiler_params=pltpu.CompilerParams(
            dimension_semantics=("parallel", "arbitrary")),
    )(x_bf, w1_bf, b1_2d, w2_bf, b2_2d)


def reference_forward_bf16(x_nchw, w1, b1, w2, b2):
    """Matches the kernel's compute path (bf16 operands, f32 accumulation)."""
    n = x_nchw.shape[0]
    x = x_nchw.reshape(n, -1).astype(jnp.bfloat16)
    h = lax.dot_general(x, w1.astype(jnp.bfloat16),
                        (((1,), (1,)), ((), ())),
                        preferred_element_type=jnp.float32) + b1
    h = jnp.maximum(h, 0.0)
    o = lax.dot_general(h.astype(jnp.bfloat16), w2.astype(jnp.bfloat16),
                        (((1,), (1,)), ((), ())),
                        preferred_element_type=jnp.float32) + b2
    return o


def reference_forward_f32(x_nchw, w1, b1, w2, b2):
    n = x_nchw.shape[0]
    x = x_nchw.reshape(n, -1)
    h = jnp.maximum(x @ w1.T + b1, 0.0)
    return h @ w2.T + b2


if __name__ == "__main__":
    # Small shapes consistent with the module: NCHW input flattened to in_f.
    N, C, H, W = 2, 4, 16, 16            # in_f = 4*16*16 = 1024
    IN_F = C * H * W
    OUT_F = 16

    key = jax.random.PRNGKey(0)
    kx, k1, kb1, k2, kb2 = jax.random.split(key, 5)

    x = jax.random.normal(kx, (N, C, H, W), dtype=jnp.float32)

    # PyTorch-style Linear init: U(-1/sqrt(fan_in), 1/sqrt(fan_in))
    bound1 = 1.0 / (IN_F ** 0.5)
    w1 = jax.random.uniform(k1, (HIDDEN, IN_F), jnp.float32, -bound1, bound1)
    b1 = jax.random.uniform(kb1, (HIDDEN,), jnp.float32, -bound1, bound1)

    bound2 = 1.0 / (HIDDEN ** 0.5)
    w2 = jax.random.uniform(k2, (OUT_F, HIDDEN), jnp.float32, -bound2, bound2)
    b2 = jax.random.uniform(kb2, (OUT_F,), jnp.float32, -bound2, bound2)

    out = head_forward(x, w1, b1, w2, b2)
    out = jax.block_until_ready(out)
    assert out.shape == (N, OUT_F), out.shape

    # Check against a reference that follows the same bf16-operand / f32-acc
    # path, and loosely against a pure-f32 reference for sanity.
    ref_bf = reference_forward_bf16(x, w1, b1, w2, b2)
    ref_f32 = reference_forward_f32(x, w1, b1, w2, b2)
    assert jnp.allclose(out, ref_bf, atol=1e-2, rtol=1e-2), "mismatch vs bf16 reference"
    assert jnp.allclose(out, ref_f32, atol=5e-2, rtol=5e-2), "mismatch vs f32 reference"

    print("KERNEL_OK")
</pallas_src>

<mosaic_0001>
module attributes {stable_mosaic.version = 11 : i64} {
  func.func @head_kernel(%arg0: i32, %arg1: i32, %arg2: memref<2x512xbf16, #tpu.memory_space<vmem>>, %arg3: memref<512x512xbf16, #tpu.memory_space<vmem>>, %arg4: memref<1x512xf32, #tpu.memory_space<vmem>>, %arg5: memref<16x512xbf16, #tpu.memory_space<vmem>>, %arg6: memref<1x16xf32, #tpu.memory_space<vmem>>, %arg7: memref<2x16xf32, #tpu.memory_space<vmem>>, %arg8: memref<2x512xf32, #tpu.memory_space<vmem>>) attributes {dimension_semantics = [#tpu.dimension_semantics<parallel>, #tpu.dimension_semantics<arbitrary>], iteration_bounds = array<i64: 1, 2>, scalar_prefetch = 0 : i64, scratch_operands = 1 : i64, tpu.core_type = #tpu.core_type<tc>, window_params = [{transform_indices = @transform_0, window_bounds = array<i64: 2, 512>}, {transform_indices = @transform_1, window_bounds = array<i64: 512, 512>}, {pipeline_mode = #tpu.pipeline_mode<synchronous>, transform_indices = @transform_2, window_bounds = array<i64: 1, 512>}, {pipeline_mode = #tpu.pipeline_mode<synchronous>, transform_indices = @transform_3, window_bounds = array<i64: 16, 512>}, {pipeline_mode = #tpu.pipeline_mode<synchronous>, transform_indices = @transform_4, window_bounds = array<i64: 1, 16>}, {transform_indices = @transform_5, window_bounds = array<i64: 2, 16>}]} {
    %c0_i32 = arith.constant 0 : i32
    %0 = arith.cmpi eq, %arg1, %c0_i32 : i32
    %1 = arith.extui %0 : i1 to i32
    %c0_i32_0 = arith.constant 0 : i32
    %2 = arith.cmpi ne, %1, %c0_i32_0 : i32
    scf.if %2 {
      %cst_9 = arith.constant 0.000000e+00 : f32
      %12 = vector.broadcast %cst_9 : f32 to vector<2x512xf32>
      %c0_10 = arith.constant 0 : index
      %c0_11 = arith.constant 0 : index
      %13 = vector.load %arg8[%c0_10, %c0_11] : memref<2x512xf32, #tpu.memory_space<vmem>>, vector<2x512xf32>
      tpu.vector_store %arg8[%c0_10, %c0_11], %12 {strides = array<i32>} : memref<2x512xf32, #tpu.memory_space<vmem>>, vector<2x512xf32>,
    } else {
    }
    %c0 = arith.constant 0 : index
    %c0_1 = arith.constant 0 : index
    %3 = vector.load %arg8[%c0, %c0_1] : memref<2x512xf32, #tpu.memory_space<vmem>>, vector<2x512xf32>
    %c0_2 = arith.constant 0 : index
    %c0_3 = arith.constant 0 : index
    %4 = vector.load %arg2[%c0_2, %c0_3] : memref<2x512xbf16, #tpu.memory_space<vmem>>, vector<2x512xbf16>
    %c0_4 = arith.constant 0 : index
    %c0_5 = arith.constant 0 : index
    %5 = vector.load %arg3[%c0_4, %c0_5] : memref<512x512xbf16, #tpu.memory_space<vmem>>, vector<512x512xbf16>
    %cst = arith.constant dense<0.000000e+00> : vector<2x512xf32>
    %6 = tpu.matmul %4, %5, %cst {dimension_numbers = #tpu.dot_dimension_numbers<[1], [1], [0], [0], [0, 0, 1, 0], [], []>} : vector<2x512xbf16>, vector<512x512xbf16>, vector<2x512xf32> -> vector<2x512xf32>
    %7 = arith.addf %3, %6 : vector<2x512xf32>
    %c0_6 = arith.constant 0 : index
    %c0_7 = arith.constant 0 : index
    %8 = vector.load %arg8[%c0_6, %c0_7] : memref<2x512xf32, #tpu.memory_space<vmem>>, vector<2x512xf32>
    tpu.vector_store %arg8[%c0_6, %c0_7], %7 {strides = array<i32>} : memref<2x512xf32, #tpu.memory_space<vmem>>, vector<2x512xf32>,
    %c1_i32 = arith.constant 1 : i32
    %9 = arith.cmpi eq, %arg1, %c1_i32 : i32
    %10 = arith.extui %9 : i1 to i32
    %c0_i32_8 = arith.constant 0 : i32
    %11 = arith.cmpi ne, %10, %c0_i32_8 : i32
    scf.if %11 {
      %c0_9 = arith.constant 0 : index
      %c0_10 = arith.constant 0 : index
      %12 = vector.load %arg8[%c0_9, %c0_10] : memref<2x512xf32, #tpu.memory_space<vmem>>, vector<2x512xf32>
      %c0_11 = arith.constant 0 : index
      %c0_12 = arith.constant 0 : index
      %13 = vector.load %arg4[%c0_11, %c0_12] : memref<1x512xf32, #tpu.memory_space<vmem>>, vector<1x512xf32>
      %14 = vector.broadcast %13 : vector<1x512xf32> to vector<2x512xf32>
      %15 = arith.addf %12, %14 : vector<2x512xf32>
      %cst_13 = arith.constant 0.000000e+00 : f32
      %16 = vector.broadcast %cst_13 : f32 to vector<2x512xf32>
      %17 = arith.maximumf %15, %16 : vector<2x512xf32>
      %18 = arith.truncf %17 : vector<2x512xf32> to vector<2x512xbf16>
      %c0_14 = arith.constant 0 : index
      %c0_15 = arith.constant 0 : index
      %19 = vector.load %arg5[%c0_14, %c0_15] : memref<16x512xbf16, #tpu.memory_space<vmem>>, vector<16x512xbf16>
      %cst_16 = arith.constant dense<0.000000e+00> : vector<2x16xf32>
      %20 = tpu.matmul %18, %19, %cst_16 {dimension_numbers = #tpu.dot_dimension_numbers<[1], [1], [0], [0], [0, 0, 1, 0], [], []>} : vector<2x512xbf16>, vector<16x512xbf16>, vector<2x16xf32> -> vector<2x16xf32>
      %c0_17 = arith.constant 0 : index
      %c0_18 = arith.constant 0 : index
      %21 = vector.load %arg6[%c0_17, %c0_18] : memref<1x16xf32, #tpu.memory_space<vmem>>, vector<1x16xf32>
      %22 = vector.broadcast %21 : vector<1x16xf32> to vector<2x16xf32>
      %23 = arith.addf %20, %22 : vector<2x16xf32>
      %c0_19 = arith.constant 0 : index
      %c0_20 = arith.constant 0 : index
      %24 = vector.load %arg7[%c0_19, %c0_20] : memref<2x16xf32, #tpu.memory_space<vmem>>, vector<2x16xf32>
      tpu.vector_store %arg7[%c0_19, %c0_20], %23 {strides = array<i32>} : memref<2x16xf32, #tpu.memory_space<vmem>>, vector<2x16xf32>,
    } else {
    }
    return
  }
  func.func @transform_0(%arg0: i32, %arg1: i32) -> (i32, i32) {
    %c0_i32 = arith.constant 0 : i32
    return %arg0, %arg1 : i32, i32
  }
  func.func @transform_1(%arg0: i32, %arg1: i32) -> (i32, i32) {
    %c0_i32 = arith.constant 0 : i32
    %c0_i32_0 = arith.constant 0 : i32
    return %c0_i32, %arg1 : i32, i32
  }
  func.func @transform_2(%arg0: i32, %arg1: i32) -> (i32, i32) {
    %c0_i32 = arith.constant 0 : i32
    %c0_i32_0 = arith.constant 0 : i32
    %c0_i32_1 = arith.constant 0 : i32
    return %c0_i32, %c0_i32_0 : i32, i32
  }
  func.func @transform_3(%arg0: i32, %arg1: i32) -> (i32, i32) {
    %c0_i32 = arith.constant 0 : i32
    %c0_i32_0 = arith.constant 0 : i32
    %c0_i32_1 = arith.constant 0 : i32
    return %c0_i32, %c0_i32_0 : i32, i32
  }
  func.func @transform_4(%arg0: i32, %arg1: i32) -> (i32, i32) {
    %c0_i32 = arith.constant 0 : i32
    %c0_i32_0 = arith.constant 0 : i32
    %c0_i32_1 = arith.constant 0 : i32
    return %c0_i32, %c0_i32_0 : i32, i32
  }
  func.func @transform_5(%arg0: i32, %arg1: i32) -> (i32, i32) {
    %c0_i32 = arith.constant 0 : i32
    %c0_i32_0 = arith.constant 0 : i32
    return %arg0, %c0_i32 : i32, i32
  }
}

</mosaic_0001>

<bundles_post_ra>
// kernel: tpu_custom_call.1
= control target key start
LH: loop header
LB: loop body
LE: loop exit
PB: predicated region body
PF: predicated region fallthrough
CT: control target
= control target key end

     0   :  { %s2638_s0 = inlined_call_operand.hbm [shape: bf16[2,1024], index: 0, kind: input, shape index: {}]   ;;  %s2639_s1 = inlined_call_operand.hbm [shape: bf16[512,1024], index: 1, kind: input, shape index: {}]   ;;  %s2640_s2 = inlined_call_operand.hbm [shape: f32[1,512], index: 2, kind: input, shape index: {}]   ;;  %s2641_s3 = inlined_call_operand.hbm [shape: bf16[16,512], index: 3, kind: input, shape index: {}]   ;;  %s2642_s4 = inlined_call_operand.vmem [shape: f32[1,16], index: 4, kind: input, shape index: {}]   ;;  %s2643_s5 = inlined_call_operand.hbm [shape: f32[2,16], index: 5, kind: output, shape index: {}]  }
   0x1   :  { %2649 = sst [smem:[#allocation17_spill]] %s2638_s0 }
   0x2   :  { %2650 = sst [smem:[#allocation18_spill]] %s2640_s2 }
   0x3   :  { %10 = vsyncpa [#allocation4], 0 }
   0x4   :  { %12 = vsyncpa [#allocation4 + $0x1], 0 }
   0x5   :  { %13 = vsyncpa [#allocation7], 0 }
   0x6   :  { %15 = vsyncpa [#allocation7 + $0x1], 0 }
   0x7   :  { %16 = vsyncpa [#allocation10], 0 }
   0x8   :  { %17 = vsyncpa [#allocation5], 0  ;;  %s2300_s18 = smov 0   ;;  %s2302_s19 = smov 0  }
   0x9   :  { %s2304_s20 = smov 0   ;;  %s2306_s21 = smov 0  }
   0xa   :  { %s2308_s22 = smov 0   ;;  %s2310_s23 = smov 0  }
   0xb LB: > { %s2329_s24 = sadd.s32 4294967295, %s2257_s23   ;;  %p57_p0 = scmp.ne.s32.totalorder %s2241_s19, %s2237_s18  ;;  %s2257_s23 = sphi %s2310_s23, %s23_s23   ;;  %s2253_s22 = sphi %s2308_s22, %s2669_s22   ;;  %s2249_s21 = sphi %s2306_s21, %s2668_s21   ;;  %s2245_s20 = sphi %s2304_s20, %s2667_s20   ;;  %s2241_s19 = sphi %s2302_s19, %s2666_s19   ;;  %s2237_s18 = sphi %s2300_s18, %s2665_s18  }
   0xc   : > { %p2644_p1 = scmp.eq.s32.totalorder %s2329_s24, 0  ;;  %p1610_p2 = scmp.ge.s32.totalorder %s2257_s23, 1 }
   0xd   : > { %p183_p3 = scmp.lt.s32.totalorder %s2257_s23, 3  ;;  %s2259_s27 = smov [#allocation8]  }
   0xe   : > { %p2337_p4 = por %p2644_p1, %p57_p0  ;;  %s196_s28 = sshll.u32 %s2259_s27, 4  ;;  %s197_s28 = int_to_ptr.vmem [resolvable:$true] %s196_s28 }
   0xf   : > { %p2341_p5 = pnand %p1610_p2, %p183_p3  ;;  %s2260_s29 = smov [#allocation9]  }
  0x10   : > { %s2651_s25 = scalar_select %p2337_p4, 1, 0 }
  0x11   : > { %s2652_s26 = scalar_select %p2341_p5, 1, 0 }
  0x12   : > { %p1783_p6 = pneg %p2341_p5  ;;  %s206_s30 = sshll.u32 %s2260_s29, 4  ;;  %s207_s30 = int_to_ptr.vmem [resolvable:$true] %s206_s30 }
  0x13   : > { %s2070_s7 = scalar_lea.vmem %s197_s28, 64  ;;  %p2078_p12 = scmp.lt.s32.totalorder %s197_s28, %s197_s28 }
  0x14   : > { %p2349_p7 = pnand %p1783_p6, %p2644_p1  ;;  %p2071_p9 = scmp.ne.s32.totalorder %s197_s28, %s2070_s7 }
  0x15   : > { %p2079_p13 = scmp.lt.s32.totalorder %s2070_s7, %s2070_s7 }
  0x16   : > { %p2061_p8 = pneg %p2349_p7 }
  0x17   : > { %p2080_p0 = por %p2079_p13, %p2078_p12 }
  0x18   : > { %p2073_p10 = pnand %p2071_p9, %p2061_p8 }
  0x1a   : > { %p2074_p11 = pneg %p2073_p10 }
  0x1c   : > { %p2081_p2 = pnand %p2080_p0, %p2074_p11 }
  0x1e   : > { %2084 = shalt.err (!%p2081_p2)
}
  0x1f   : > { %s2654_s2 = sld [smem:[#allocation18_spill]]  ;;  %s2096_s10 = scalar_lea.vmem %s207_s30, 512 }
  0x20   : > { %p2097_p3 = scmp.ne.s32.totalorder %s207_s30, %s2096_s10  ;;  %p2104_p9 = scmp.lt.s32.totalorder %s207_s30, %s207_s30 }
  0x21   : > { %p2105_p10 = scmp.lt.s32.totalorder %s2096_s10, %s2096_s10 }
  0x22   : > { %p2099_p6 = pnand %p2097_p3, %p2061_p8 }
  0x23   : > { %p2106_p4 = por %p2105_p10, %p2104_p9 }
  0x24   : > { %p2100_p1 = pneg %p2099_p6 }
  0x25   : > { %1786 = dma.hbm_to_vmem [thread:$0]  (!%p2349_p7), %s2654_s2, 64, %s197_s28, [#allocation7]  }
  0x26   : > { %p2107_p5 = pnand %p2106_p4, %p2100_p1 }
  0x28   : > { %2110 = shalt.err (!%p2107_p5)
}
  0x29   : > { %s2647_s11 = smov 256   ;;  %s2648_s12 = smov 16  }
  0x2a   : > { %1789 = dma.hbm_to_vmem [thread:$0]  (!%p2349_p7), %s2641_s3, 512, %s207_s30, [#allocation10], %s2647_s11, %s2647_s11, %s2648_s12  }
  0x2b   : > { %s32_s15 = sadd.s32 1, %s2253_s22  ;;  %s44_s16 = sadd.s32 1, %s2245_s20 }
  0x2c   : > { %p33_p1 = scmp.ge.s32.totalorder %s32_s15, 2  ;;  %p51_p4 = scmp.ne.s32.totalorder %s2245_s20, %s2241_s19 }
  0x2d   : > { %p52_p5 = scmp.eq.s32.totalorder %s2257_s23, 0  ;;  %p1799_p8 = scmp.lt.s32.totalorder %s2257_s23, 2 }
  0x2e   : > { %s2671_s15 = smov (%p33_p1, %s32_s15), 0  ;;  %s2383_s17 = sand.u32 1, %s2245_s20  }
  0x2f   : > { %p53_p11 = por %p52_p5, %p51_p4  ;;  %s40_s18 = ssub.s32 %s2253_s22, %s2671_s15 }
  0x30   : > { %p42_p12 = scmp.eq.s32.totalorder %s40_s18, 0  ;;  %s1614_s27 = sshll.u32 %s2383_s17, 2 }
  0x31   : > { %s1765_s28 = sshll.u32 %s2253_s22, 6  ;;  %s2655_s0 = sld [smem:[#allocation17_spill]] }
  0x32   : > { %s2390_s29 = scalar_select %p42_p12, %s2245_s20, %s44_s16  }
  0x33   : > { %s227_s8 = scalar_lea.vmem [#allocation3], %s1614_s27  ;;  %p2397_p7 = pnand %p1799_p8, %p53_p11 }
  0x34   : > { %s237_s9 = sshll.u32 %s227_s8, 4  ;;  %s1617_s13 = sshll.u32 %s2383_s17, 10  ;;  %s238_s9 = int_to_ptr.vmem [resolvable:$true] %s237_s9 }
  0x35   : > { %s1766_s14 = sshll.u32 %s2253_s22, 8  ;;  %s224_s18 = scalar_lea.sflag [#allocation4], %s2383_s17 }
  0x36   : > { %p2113_p13 = pneg %p2397_p7  ;;  %s2124_s16 = scalar_lea.vmem %s238_s9, 64 }
  0x37   : > { %s235_s7 = scalar_lea.hbm %s2655_s0, %s1765_s28  ;;  %p2125_p0 = scmp.ne.s32.totalorder %s238_s9, %s2124_s16 }
  0x38   : > { %s2263_s27 = smov [#allocation3]  }
  0x39   : > { %p2127_p2 = pnand %p2125_p0, %p2113_p13  ;;  %s2129_s28 = sshll.u32 %s2263_s27, 4  ;;  %s2130_s28 = int_to_ptr.vmem [resolvable:$false] %s2129_s28 }
  0x3a   : > { %s2131_s30 = scalar_lea.vmem %s2130_s28, 128  ;;  %p2132_p6 = scmp.lt.s32.totalorder %s238_s9, %s2130_s28 }
  0x3b   : > { %p2128_p3 = pneg %p2127_p2  ;;  %p2133_p9 = scmp.lt.s32.totalorder %s2131_s30, %s2124_s16 }
  0x3d   : > { %p2134_p10 = por %p2133_p9, %p2132_p6 }
  0x3f   : > { %p2135_p1 = pnand %p2134_p10, %p2128_p3 }
  0x41   : > { %2138 = shalt.err (!%p2135_p1)
}
  0x42   : > { %1793 = dma.hbm_to_vmem [thread:$0]  (!%p2397_p7), %s235_s7, 64, %s238_s9, %s224_s18  }
  0x43   : > { %s254_s8 = scalar_lea.hbm %s2639_s1, %s1766_s14  ;;  %s248_s11 = scalar_lea.vmem [#allocation6], %s1617_s13 }
  0x44   : > { %s255_s12 = sshll.u32 %s248_s11, 4  ;;  %s244_s27 = sand.u32 1, %s2257_s23   ;;  %s256_s12 = int_to_ptr.vmem [resolvable:$true] %s255_s12 }
  0x45   : > { %s245_s0 = scalar_lea.sflag [#allocation7], %s244_s27  ;;  %s2152_s2 = scalar_lea.vmem %s256_s12, 16384 }
  0x46   : > { %p2153_p4 = scmp.ne.s32.totalorder %s256_s12, %s2152_s2  ;;  %s2264_s16 = smov [#allocation6]  }
  0x47   : > { %s2157_s28 = sshll.u32 %s2264_s16, 4  ;;  %s2158_s28 = int_to_ptr.vmem [resolvable:$false] %s2157_s28 }
  0x48   : > { %p2155_p5 = pnand %p2153_p4, %p2113_p13  ;;  %s2159_s30 = scalar_lea.vmem %s2158_s28, 32768 }
  0x49   : > { %p2160_p11 = scmp.lt.s32.totalorder %s256_s12, %s2158_s28  ;;  %p2161_p12 = scmp.lt.s32.totalorder %s2159_s30, %s2152_s2 }
  0x4a   : > { %p2156_p8 = pneg %p2155_p5 }
  0x4b   : > { %p2162_p0 = por %p2161_p12, %p2160_p11 }
  0x4d   : > { %p2163_p2 = pnand %p2162_p0, %p2156_p8 }
  0x4f   : > { %2166 = shalt.err (!%p2163_p2)
}
  0x50   : > { %s2265_s7 = smov 512   ;;  %s2657_s11 = smov 16  }
  0x51   : > { %s2658_s9 = smov 256   ;;  %p2659_p3 = scmp.ne.s32.totalorder %s2652_s26, 0 }
  0x52   : > { %1796 = dma.hbm_to_vmem [thread:$0]  (!%p2397_p7), %s254_s8, 16384, %s256_s12, %s245_s0, %s2265_s7, %s2658_s9, %s2657_s11  }
  0x53   : > { %267 = sbr.rel (%p2659_p3) target bundleno = 809 (0x329), region = 40  ;;  %s269_s13 = sand.u32 (!%p2659_p3), 1, %s2241_s19  }
  0x54   : > { %s1621_s14 = sshll.u32 (!%p2659_p3), %s269_s13, 2  ;;  %s270_s18 = scalar_lea.sflag (!%p2659_p3), [#allocation4], %s269_s13 }
  0x55   : > { %s2425_s17 = scalar_lea.vmem (!%p2659_p3), [#allocation3], %s1621_s14  ;;  %p2660_p13 = scmp.ne.s32.totalorder (!%p2659_p3), %s2651_s25, 0 }
  0x58   : > { %2216 = dma.done.wait (%p2660_p13), %s270_s18, 64  }
  0x59   : > { %2218 = vsyncadd (%p2660_p13), %s270_s18, 4294967232  ;;  %s278_s2 = sand.u32 1, %s2329_s24   ;;  %s1622_s10 = sshll.u32 %s269_s13, 10 }
  0x5a   : > { %s279_s0 = scalar_lea.sflag [#allocation7], %s278_s2  ;;  %s2432_s12 = scalar_lea.vmem [#allocation6], %s1622_s10 }
  0x5b   : > { %2220 = dma.done.wait (%p2660_p13), %s279_s0, 16384  }
  0x5c   : > { %2222 = vsyncadd (%p2660_p13), %s279_s0, 4294950912  ;;  %p2661_p7 = scmp.eq.s32.totalorder %s2329_s24, 0 }
  0x5e   : > { %2224 = dma.done.wait (%p2661_p7), [#allocation7], 64   ;;  %p2662_p6 = pmov %p2661_p7 }
  0x60   : > { %2226 = vsyncadd (%p2662_p6), [#allocation7], 4294967232  ;;  %p2663_p9 = pmov %p2662_p6 }
  0x61   : > { %p2664_p10 = pmov %p2662_p6 }
  0x62   : > { %2228 = dma.done.wait (%p2663_p9), [#allocation10], 512  }
  0x63   : > { %2230 = vsyncadd (%p2664_p10), [#allocation10], 4294966784  ;;  %p1625_p1 = scmp.ne.s32.totalorder %s2249_s21, 0 }
  0x65   : > { %323 = sbr.rel (%p1625_p1) target bundleno = 108 (0x6c), region = 60 }
  0x6a   : > { %v2266_v0 = vmov 0.0  }
  0x6b   : > { %324 = vst [vmem:[#allocation2] sm:$0xff] %v2266_v0 }
  0x6c PF: > { %v1861_v1 = vld [vmem:[%s2432_s12 + $0xe4] ss:$16 sps:$4 sm:$0xff]   ;;  %v1863_v2 = vld [vmem:[%s2432_s12 + $0xec] ss:$16 sps:$4 sm:$0xff]   ;;  %v1865_v3 = vld [vmem:[%s2432_s12 + $0xe0] ss:$16 sps:$4 sm:$0xff]   ;;  %v467_v24 = vlaneseq }
  0x6d   : > { %1124 = vmatprep.subr.bf16.mxu0 %v1861_v1  ;;  %v1866_v4 = vld [vmem:[%s2432_s12 + $0xe8] ss:$16 sps:$4 sm:$0xff]   ;;  %1165 = vmatprep.subr.bf16.mxu1 %v1863_v2  ;;  %v1867_v5 = vld [vmem:[%s2432_s12 + $0xc4] ss:$16 sps:$4 sm:$0xff]   ;;  %v1869_v6 = vld [vmem:[%s2432_s12 + $0xcc] ss:$16 sps:$4 sm:$0xff]  }
  0x6e   : > { %1125 = vmatpush1.bf16.xpose.msra.mxu0 %v1865_v3  ;;  %1166 = vmatpush1.bf16.xpose.msra.mxu1 %v1866_v4  ;;  %v1871_v7 = vld [vmem:[%s2432_s12 + $0xc0] ss:$16 sps:$4 sm:$0xff]   ;;  %v1872_v8 = vld [vmem:[%s2432_s12 + $0xc8] ss:$16 sps:$4 sm:$0xff]   ;;  %v1873_v9 = vld [vmem:[%s2432_s12 + $0xa4] ss:$16 sps:$4 sm:$0xff]  }
  0x6f   : > { %1126 = vmatprep.subr.bf16.mxu0 %v1867_v5  ;;  %1167 = vmatprep.subr.bf16.mxu1 %v1869_v6  ;;  %v1875_v10 = vld [vmem:[%s2432_s12 + $0xac] ss:$16 sps:$4 sm:$0xff]   ;;  %v1877_v11 = vld [vmem:[%s2432_s12 + $0xa0] ss:$16 sps:$4 sm:$0xff]   ;;  %v1878_v12 = vld [vmem:[%s2432_s12 + $0xa8] ss:$16 sps:$4 sm:$0xff]  }
  0x70   : > { %v1879_v13 = vld [vmem:[%s2432_s12 + $0x84] ss:$16 sps:$4 sm:$0xff]   ;;  %v1881_v14 = vld [vmem:[%s2432_s12 + $0x8c] ss:$16 sps:$4 sm:$0xff]   ;;  %v1883_v15 = vld [vmem:[%s2432_s12 + $0x80] ss:$16 sps:$4 sm:$0xff]  }
  0x71   : > { %v1884_v16 = vld [vmem:[%s2432_s12 + $0x88] ss:$16 sps:$4 sm:$0xff]   ;;  %v1885_v17 = vld [vmem:[%s2432_s12 + $0x64] ss:$16 sps:$4 sm:$0xff]   ;;  %v1887_v18 = vld [vmem:[%s2432_s12 + $0x6c] ss:$16 sps:$4 sm:$0xff]  }
  0x72   : > { %v1889_v19 = vld [vmem:[%s2432_s12 + $0x60] ss:$16 sps:$4 sm:$0xff]   ;;  %v1890_v20 = vld [vmem:[%s2432_s12 + $0x68] ss:$16 sps:$4 sm:$0xff]   ;;  %v1891_v21 = vld [vmem:[%s2432_s12 + $0x44] ss:$16 sps:$4 sm:$0xff]  }
  0x73   : > { %v2267_v22 = vmov 1966171168   ;;  %v1893_v25 = vld [vmem:[%s2432_s12 + $0x4c] ss:$16 sps:$4 sm:$0xff]   ;;  %v2469_v27 = vshrl.u32 %v467_v24, 7  ;;  %p1755_p4 = scmp.ne.s32.totalorder %s2249_s21, 1 }
  0x74   : > { %v465_v23 = vunpack.c.l.s4 %v2267_v22  ;;  %v1895_v28 = vld [vmem:[%s2432_s12 + $0x40] ss:$16 sps:$4 sm:$0xff]   ;;  %v1896_v29 = vld [vmem:[%s2432_s12 + $0x48] ss:$16 sps:$4 sm:$0xff]   ;;  %v1897_v30 = vld [vmem:[%s2432_s12 + $0x24] ss:$16 sps:$4 sm:$0xff]  }
  0x75   : > { %v1899_v32 = vld [vmem:[%s2432_s12 + $0x2c] ss:$16 sps:$4 sm:$0xff]   ;;  %v1901_v37 = vld [vmem:[%s2432_s12 + $0x20] ss:$16 sps:$4 sm:$0xff]   ;;  %v1902_v38 = vld [vmem:[%s2432_s12 + $0x28] ss:$16 sps:$4 sm:$0xff]  }
  0x76   : > { %1127 = vmatpush1.bf16.xpose.msra.mxu0 %v1871_v7  ;;  %1168 = vmatpush1.bf16.xpose.msra.mxu1 %v1872_v8  ;;  %v466_v26 = vunpack.c.0.s8 %v465_v23  ;;  %v1626_v33 = vld.sshfl [vmem:[%s2425_s17] sm:$0x33 pattern:$0x75316420]  ;;  %v1903_v40 = vld [vmem:[%s2432_s12 + $0x4] ss:$16 sps:$4 sm:$0xff]  }
  0x77   : > { %1128 = vmatprep.subr.bf16.mxu0 %v1873_v9  ;;  %1169 = vmatprep.subr.bf16.mxu1 %v1875_v10  ;;  %v463_v34 = vcombine.high %v1626_v33, %v1626_v33  ;;  %v1905_v41 = vld [vmem:[%s2432_s12 + $0xc] ss:$16 sps:$4 sm:$0xff]   ;;  %v1907_v42 = vld [vmem:[%s2432_s12] ss:$16 sps:$4 sm:$0xff]   ;;  %v1908_v43 = vld [vmem:[%s2432_s12 + $0x8] ss:$16 sps:$4 sm:$0xff]  }
  0x78   : > { %v469_v31 = vsub.s32 %v466_v26, %v2469_v27  ;;  %v1909_v44 = vld [vmem:[%s2432_s12 + $0x1e4] ss:$16 sps:$4 sm:$0xff]   ;;  %v1911_v45 = vld [vmem:[%s2432_s12 + $0x1ec] ss:$16 sps:$4 sm:$0xff]   ;;  %v1913_v46 = vld [vmem:[%s2432_s12 + $0x1e0] ss:$16 sps:$4 sm:$0xff]  }
  0x79   : > { %v1914_v47 = vld [vmem:[%s2432_s12 + $0x1e8] ss:$16 sps:$4 sm:$0xff]   ;;  %v1915_v48 = vld [vmem:[%s2432_s12 + $0x1c4] ss:$16 sps:$4 sm:$0xff]   ;;  %v1917_v49 = vld [vmem:[%s2432_s12 + $0x1cc] ss:$16 sps:$4 sm:$0xff]  }
  0x7a   : > { %v2477_v35 = vrot.slane %v1626_v33, %v469_v31  ;;  %v2479_v36 = vrot.slane %v463_v34, %v469_v31  ;;  %v1919_v50 = vld [vmem:[%s2432_s12 + $0x1c0] ss:$16 sps:$4 sm:$0xff]   ;;  %v1920_v51 = vld [vmem:[%s2432_s12 + $0x1c8] ss:$16 sps:$4 sm:$0xff]   ;;  %v1921_v52 = vld [vmem:[%s2432_s12 + $0x1a4] ss:$16 sps:$4 sm:$0xff]  }
  0x7b   : > { %v1923_v53 = vld [vmem:[%s2432_s12 + $0x1ac] ss:$16 sps:$4 sm:$0xff]   ;;  %v1925_v54 = vld [vmem:[%s2432_s12 + $0x1a0] ss:$16 sps:$4 sm:$0xff]   ;;  %v1926_v55 = vld [vmem:[%s2432_s12 + $0x1a8] ss:$16 sps:$4 sm:$0xff]  }
  0x7c   : > { %1156 = vmatprep.mubr.bf16.mxu0 %v2479_v36  ;;  %v2486_v39 = vcombine.high %v2479_v36, %v2479_v36  ;;  %v1927_v56 = vld [vmem:[%s2432_s12 + $0x184] ss:$16 sps:$4 sm:$0xff]   ;;  %v1929_v57 = vld [vmem:[%s2432_s12 + $0x18c] ss:$16 sps:$4 sm:$0xff]   ;;  %v1931_v58 = vld [vmem:[%s2432_s12 + $0x180] ss:$16 sps:$4 sm:$0xff]  }
  0x7d   : > { %v1932_v59 = vld [vmem:[%s2432_s12 + $0x188] ss:$16 sps:$4 sm:$0xff]   ;;  %v1933_v60 = vld [vmem:[%s2432_s12 + $0x164] ss:$16 sps:$4 sm:$0xff]   ;;  %v1935_v61 = vld [vmem:[%s2432_s12 + $0x16c] ss:$16 sps:$4 sm:$0xff]  }
  0x7e   : > { %1129 = vmatpush1.bf16.xpose.msra.mxu0 %v1877_v11  ;;  %1170 = vmatpush1.bf16.xpose.msra.mxu1 %v1878_v12  ;;  %v1937_v62 = vld [vmem:[%s2432_s12 + $0x160] ss:$16 sps:$4 sm:$0xff]   ;;  %v1938_v63 = vld [vmem:[%s2432_s12 + $0x168] ss:$16 sps:$4 sm:$0xff]   ;;  %v1939_v0 = vld [vmem:[%s2432_s12 + $0x144] ss:$16 sps:$4 sm:$0xff]  }
  0x7f   : > { %1130 = vmatprep.subr.bf16.mxu0 %v1879_v13  ;;  %1171 = vmatprep.subr.bf16.mxu1 %v1881_v14  ;;  %v1941_v1 = vld [vmem:[%s2432_s12 + $0x14c] ss:$16 sps:$4 sm:$0xff]   ;;  %v1943_v2 = vld [vmem:[%s2432_s12 + $0x140] ss:$16 sps:$4 sm:$0xff]   ;;  %v1944_v3 = vld [vmem:[%s2432_s12 + $0x148] ss:$16 sps:$4 sm:$0xff]   ;;  %v2529_v14 = vcombine.high %v2477_v35, %v2477_v35 }
  0x80   : > { %1197 = vmatprep.mubr.bf16.mxu1 %v2486_v39  ;;  %v1945_v4 = vld [vmem:[%s2432_s12 + $0x124] ss:$16 sps:$4 sm:$0xff]   ;;  %v1947_v5 = vld [vmem:[%s2432_s12 + $0x12c] ss:$16 sps:$4 sm:$0xff]   ;;  %v1949_v6 = vld [vmem:[%s2432_s12 + $0x120] ss:$16 sps:$4 sm:$0xff]  }
  0x81   : > { %v1950_v7 = vld [vmem:[%s2432_s12 + $0x128] ss:$16 sps:$4 sm:$0xff]   ;;  %v1951_v8 = vld [vmem:[%s2432_s12 + $0x104] ss:$16 sps:$4 sm:$0xff]   ;;  %v1953_v9 = vld [vmem:[%s2432_s12 + $0x10c] ss:$16 sps:$4 sm:$0xff]  }
  0x82   : > { %v1955_v10 = vld [vmem:[%s2432_s12 + $0x100] ss:$16 sps:$4 sm:$0xff]   ;;  %v1956_v11 = vld [vmem:[%s2432_s12 + $0x108] ss:$16 sps:$4 sm:$0xff]   ;;  %v1959_v12 = vld [vmem:[%s2432_s12 + $0x2e4] ss:$16 sps:$4 sm:$0xff]  }
  0x83   : > { %v1962_v13 = vld [vmem:[%s2432_s12 + $0x2ec] ss:$16 sps:$4 sm:$0xff]   ;;  %v1969_v23 = vld [vmem:[%s2432_s12 + $0x2a0] ss:$16 sps:$4 sm:$0xff]   ;;  %v1972_v24 = vld [vmem:[%s2432_s12 + $0x2a8] ss:$16 sps:$4 sm:$0xff]  }
  0x84   : > { %v1974_v22 = vld [vmem:[%s2432_s12 + $0x2ac] ss:$16 sps:$4 sm:$0xff]   ;;  %v1984_v33 = vld [vmem:[%s2432_s12 + $0x268] ss:$16 sps:$4 sm:$0xff]   ;;  %v1989_v34 = vld [vmem:[%s2432_s12 + $0x244] ss:$16 sps:$4 sm:$0xff]  }
  0x85   : > { %v1980_v26 = vld [vmem:[%s2432_s12 + $0x28c] ss:$16 sps:$4 sm:$0xff]  }
  0x86   : > { %1131 = vmatpush1.bf16.xpose.msra.mxu0 %v1883_v15  ;;  %1172 = vmatpush1.bf16.xpose.msra.mxu1 %v1884_v16  ;;  %v1957_v15 = vld [vmem:[%s2432_s12 + $0x2e0] ss:$16 sps:$4 sm:$0xff]   ;;  %v1960_v16 = vld [vmem:[%s2432_s12 + $0x2e8] ss:$16 sps:$4 sm:$0xff]   ;;  %v1986_v31 = vld [vmem:[%s2432_s12 + $0x26c] ss:$16 sps:$4 sm:$0xff]  }
  0x87   : > { %1132 = vmatprep.subr.bf16.mxu0 %v1885_v17  ;;  %1173 = vmatprep.subr.bf16.mxu1 %v1887_v18  ;;  %v1965_v17 = vld [vmem:[%s2432_s12 + $0x2c4] ss:$16 sps:$4 sm:$0xff]   ;;  %v1968_v18 = vld [vmem:[%s2432_s12 + $0x2cc] ss:$16 sps:$4 sm:$0xff]  }
  0x8e   : > { %1133 = vmatpush1.bf16.xpose.msra.mxu0 %v1889_v19  ;;  %1174 = vmatpush1.bf16.xpose.msra.mxu1 %v1890_v20  ;;  %v1963_v19 = vld [vmem:[%s2432_s12 + $0x2c0] ss:$16 sps:$4 sm:$0xff]   ;;  %v1966_v20 = vld [vmem:[%s2432_s12 + $0x2c8] ss:$16 sps:$4 sm:$0xff]  }
  0x8f   : > { %1134 = vmatprep.subr.bf16.mxu0 %v1891_v21  ;;  %1175 = vmatprep.subr.bf16.mxu1 %v1893_v25  ;;  %v1971_v21 = vld [vmem:[%s2432_s12 + $0x2a4] ss:$16 sps:$4 sm:$0xff]  }
  0x90   : > { %v1977_v25 = vld [vmem:[%s2432_s12 + $0x284] ss:$16 sps:$4 sm:$0xff]  }
  0x96   : > { %1135 = vmatpush1.bf16.xpose.msra.mxu0 %v1895_v28  ;;  %1176 = vmatpush1.bf16.xpose.msra.mxu1 %v1896_v29  ;;  %v1975_v28 = vld [vmem:[%s2432_s12 + $0x280] ss:$16 sps:$4 sm:$0xff]   ;;  %v1978_v29 = vld [vmem:[%s2432_s12 + $0x288] ss:$16 sps:$4 sm:$0xff]  }
  0x97   : > { %1136 = vmatprep.subr.bf16.mxu0 %v1897_v30  ;;  %1177 = vmatprep.subr.bf16.mxu1 %v1899_v32  ;;  %v1983_v30 = vld [vmem:[%s2432_s12 + $0x264] ss:$16 sps:$4 sm:$0xff]   ;;  %v1981_v32 = vld [vmem:[%s2432_s12 + $0x260] ss:$16 sps:$4 sm:$0xff]  }
  0x9e   : > { %1137 = vmatpush1.bf16.xpose.msra.mxu0 %v1901_v37  ;;  %1178 = vmatpush1.bf16.xpose.msra.mxu1 %v1902_v38  ;;  %v1987_v37 = vld [vmem:[%s2432_s12 + $0x240] ss:$16 sps:$4 sm:$0xff]   ;;  %v1990_v38 = vld [vmem:[%s2432_s12 + $0x248] ss:$16 sps:$4 sm:$0xff]  }
  0x9f   : > { %1138 = vmatprep.subr.bf16.mxu0 %v1903_v40  ;;  %1179 = vmatprep.subr.bf16.mxu1 %v1905_v41  ;;  %v1998_v40 = vld [vmem:[%s2432_s12 + $0x22c] ss:$16 sps:$4 sm:$0xff]   ;;  %v1993_v41 = vld [vmem:[%s2432_s12 + $0x220] ss:$16 sps:$4 sm:$0xff]  }
  0xa6   : > { %1139 = vmatpush1.bf16.xpose.msra.mxu0 %v1907_v42  ;;  %1180 = vmatpush1.bf16.xpose.msra.mxu1 %v1908_v43  ;;  %v1996_v42 = vld [vmem:[%s2432_s12 + $0x228] ss:$16 sps:$4 sm:$0xff]   ;;  %v2001_v43 = vld [vmem:[%s2432_s12 + $0x204] ss:$16 sps:$4 sm:$0xff]  }
  0xa7   : > { %1140 = vmatprep.subr.bf16.mxu0 %v1909_v44  ;;  %1181 = vmatprep.subr.bf16.mxu1 %v1911_v45  ;;  %v2004_v44 = vld [vmem:[%s2432_s12 + $0x20c] ss:$16 sps:$4 sm:$0xff]   ;;  %v1999_v45 = vld [vmem:[%s2432_s12 + $0x200] ss:$16 sps:$4 sm:$0xff]  }
  0xae   : > { %1141 = vmatpush2.bf16.xpose.msra.mxu0 %v1913_v46  ;;  %1182 = vmatpush2.bf16.xpose.msra.mxu1 %v1914_v47  ;;  %v2002_v46 = vld [vmem:[%s2432_s12 + $0x208] ss:$16 sps:$4 sm:$0xff]   ;;  %v2007_v47 = vld [vmem:[%s2432_s12 + $0x3e4] ss:$16 sps:$4 sm:$0xff]  }
  0xaf   : > { %1142 = vmatprep.subr.bf16.mxu0 %v1915_v48  ;;  %1183 = vmatprep.subr.bf16.mxu1 %v1917_v49  ;;  %v2010_v48 = vld [vmem:[%s2432_s12 + $0x3ec] ss:$16 sps:$4 sm:$0xff]   ;;  %v2005_v49 = vld [vmem:[%s2432_s12 + $0x3e0] ss:$16 sps:$4 sm:$0xff]  }
  0xb6   : > { %1143 = vmatpush2.bf16.xpose.msra.mxu0 %v1919_v50  ;;  %1184 = vmatpush2.bf16.xpose.msra.mxu1 %v1920_v51  ;;  %v2008_v50 = vld [vmem:[%s2432_s12 + $0x3e8] ss:$16 sps:$4 sm:$0xff]   ;;  %v2013_v51 = vld [vmem:[%s2432_s12 + $0x3c4] ss:$16 sps:$4 sm:$0xff]  }
  0xb7   : > { %1144 = vmatprep.subr.bf16.mxu0 %v1921_v52  ;;  %1185 = vmatprep.subr.bf16.mxu1 %v1923_v53  ;;  %v2016_v52 = vld [vmem:[%s2432_s12 + $0x3cc] ss:$16 sps:$4 sm:$0xff]   ;;  %v2011_v53 = vld [vmem:[%s2432_s12 + $0x3c0] ss:$16 sps:$4 sm:$0xff]  }
  0xbe   : > { %1145 = vmatpush2.bf16.xpose.msra.mxu0 %v1925_v54  ;;  %1186 = vmatpush2.bf16.xpose.msra.mxu1 %v1926_v55  ;;  %v2014_v54 = vld [vmem:[%s2432_s12 + $0x3c8] ss:$16 sps:$4 sm:$0xff]   ;;  %v2019_v55 = vld [vmem:[%s2432_s12 + $0x3a4] ss:$16 sps:$4 sm:$0xff]  }
  0xbf   : > { %1146 = vmatprep.subr.bf16.mxu0 %v1927_v56  ;;  %1187 = vmatprep.subr.bf16.mxu1 %v1929_v57  ;;  %v2022_v56 = vld [vmem:[%s2432_s12 + $0x3ac] ss:$16 sps:$4 sm:$0xff]   ;;  %v2017_v57 = vld [vmem:[%s2432_s12 + $0x3a0] ss:$16 sps:$4 sm:$0xff]  }
  0xc6   : > { %1147 = vmatpush2.bf16.xpose.msra.mxu0 %v1931_v58  ;;  %1188 = vmatpush2.bf16.xpose.msra.mxu1 %v1932_v59  ;;  %v2020_v58 = vld [vmem:[%s2432_s12 + $0x3a8] ss:$16 sps:$4 sm:$0xff]   ;;  %v2025_v59 = vld [vmem:[%s2432_s12 + $0x384] ss:$16 sps:$4 sm:$0xff]  }
  0xc7   : > { %1148 = vmatprep.subr.bf16.mxu0 %v1933_v60  ;;  %1189 = vmatprep.subr.bf16.mxu1 %v1935_v61  ;;  %v2028_v60 = vld [vmem:[%s2432_s12 + $0x38c] ss:$16 sps:$4 sm:$0xff]   ;;  %v2023_v61 = vld [vmem:[%s2432_s12 + $0x380] ss:$16 sps:$4 sm:$0xff]  }
  0xce   : > { %1149 = vmatpush2.bf16.xpose.msra.mxu0 %v1937_v62  ;;  %1190 = vmatpush2.bf16.xpose.msra.mxu1 %v1938_v63  ;;  %v2026_v62 = vld [vmem:[%s2432_s12 + $0x388] ss:$16 sps:$4 sm:$0xff]   ;;  %v2031_v63 = vld [vmem:[%s2432_s12 + $0x364] ss:$16 sps:$4 sm:$0xff]  }
  0xcf   : > { %1150 = vmatprep.subr.bf16.mxu0 %v1939_v0  ;;  %1191 = vmatprep.subr.bf16.mxu1 %v1941_v1  ;;  %v2034_v0 = vld [vmem:[%s2432_s12 + $0x36c] ss:$16 sps:$4 sm:$0xff]   ;;  %v2029_v1 = vld [vmem:[%s2432_s12 + $0x360] ss:$16 sps:$4 sm:$0xff]  }
  0xd6   : > { %1151 = vmatpush2.bf16.xpose.msra.mxu0 %v1943_v2  ;;  %1192 = vmatpush2.bf16.xpose.msra.mxu1 %v1944_v3  ;;  %v2032_v2 = vld [vmem:[%s2432_s12 + $0x368] ss:$16 sps:$4 sm:$0xff]   ;;  %v2037_v3 = vld [vmem:[%s2432_s12 + $0x344] ss:$16 sps:$4 sm:$0xff]  }
  0xd7   : > { %1152 = vmatprep.subr.bf16.mxu0 %v1945_v4  ;;  %1193 = vmatprep.subr.bf16.mxu1 %v1947_v5  ;;  %v2040_v4 = vld [vmem:[%s2432_s12 + $0x34c] ss:$16 sps:$4 sm:$0xff]   ;;  %v2035_v5 = vld [vmem:[%s2432_s12 + $0x340] ss:$16 sps:$4 sm:$0xff]  }
  0xde   : > { %1153 = vmatpush2.bf16.xpose.msra.mxu0 %v1949_v6  ;;  %1194 = vmatpush2.bf16.xpose.msra.mxu1 %v1950_v7  ;;  %v2038_v6 = vld [vmem:[%s2432_s12 + $0x348] ss:$16 sps:$4 sm:$0xff]   ;;  %v2043_v7 = vld [vmem:[%s2432_s12 + $0x324] ss:$16 sps:$4 sm:$0xff]  }
  0xdf   : > { %1154 = vmatprep.subr.bf16.mxu0 %v1951_v8  ;;  %1195 = vmatprep.subr.bf16.mxu1 %v1953_v9  ;;  %v2046_v8 = vld [vmem:[%s2432_s12 + $0x32c] ss:$16 sps:$4 sm:$0xff]   ;;  %v2041_v9 = vld [vmem:[%s2432_s12 + $0x320] ss:$16 sps:$4 sm:$0xff]  }
  0xe6   : > { %1155 = vmatpush2.bf16.xpose.msra.mxu0 %v1955_v10  ;;  %1196 = vmatpush2.bf16.xpose.msra.mxu1 %v1956_v11  ;;  %v2044_v10 = vld [vmem:[%s2432_s12 + $0x328] ss:$16 sps:$4 sm:$0xff]   ;;  %v2049_v11 = vld [vmem:[%s2432_s12 + $0x304] ss:$16 sps:$4 sm:$0xff]  }
  0xe7   : > { %1206 = vmatprep.subr.bf16.mxu0 %v1959_v12  ;;  %1247 = vmatprep.subr.bf16.mxu1 %v1962_v13  ;;  %v2052_v12 = vld [vmem:[%s2432_s12 + $0x30c] ss:$16 sps:$4 sm:$0xff]   ;;  %v2047_v13 = vld [vmem:[%s2432_s12 + $0x300] ss:$16 sps:$4 sm:$0xff]  }
  0xed   : > { %1157 = vmatmul.mubr.bf16.vlgmr.msra.gmra.mxu0 %v2477_v35  ;;  %1198 = vmatmul.mubr.bf16.vlgmr.msra.gmra.mxu1 %v2529_v14 }
  0xee   : > { %1207 = vmatpush1.bf16.xpose.msra.mxu0 %v1957_v15  ;;  %1248 = vmatpush1.bf16.xpose.msra.mxu1 %v1960_v16  ;;  %v2050_v15 = vld [vmem:[%s2432_s12 + $0x308] ss:$16 sps:$4 sm:$0xff]  }
  0xef   : > { %1208 = vmatprep.subr.bf16.mxu0 %v1965_v17  ;;  %1249 = vmatprep.subr.bf16.mxu1 %v1968_v18 }
  0xf0   : > { %1238 = vmatprep.mubr.bf16.mxu0 %v2479_v36  ;;  %1279 = vmatprep.mubr.bf16.mxu1 %v2486_v39  ;;  %v1992_v36 = vld [vmem:[%s2432_s12 + $0x24c] ss:$16 sps:$4 sm:$0xff]   ;;  %v1995_v39 = vld [vmem:[%s2432_s12 + $0x224] ss:$16 sps:$4 sm:$0xff]  }
  0xf6   : > { %1209 = vmatpush1.bf16.xpose.msra.mxu0 %v1963_v19  ;;  %1250 = vmatpush1.bf16.xpose.msra.mxu1 %v1966_v20 }
  0xf7   : > { %1210 = vmatprep.subr.bf16.mxu0 %v1971_v21  ;;  %1251 = vmatprep.subr.bf16.mxu1 %v1974_v22 }
  0xfe   : > { %1211 = vmatpush1.bf16.xpose.msra.mxu0 %v1969_v23  ;;  %1252 = vmatpush1.bf16.xpose.msra.mxu1 %v1972_v24 }
  0xff   : > { %1212 = vmatprep.subr.bf16.mxu0 %v1977_v25  ;;  %1253 = vmatprep.subr.bf16.mxu1 %v1980_v26 }
 0x106   : > { %1213 = vmatpush1.bf16.xpose.msra.mxu0 %v1975_v28  ;;  %1254 = vmatpush1.bf16.xpose.msra.mxu1 %v1978_v29  ;;  %v2268_v28 = vmov 1983009808  }
 0x107   : > { %1214 = vmatprep.subr.bf16.mxu0 %v1983_v30  ;;  %1255 = vmatprep.subr.bf16.mxu1 %v1986_v31  ;;  %v1295_v29 = vunpack.c.l.s4 %v2268_v28 }
 0x109   : > { %v1296_v30 = vunpack.c.0.s8 %v1295_v29 }
 0x10e   : > { %1215 = vmatpush1.bf16.xpose.msra.mxu0 %v1981_v32  ;;  %1256 = vmatpush1.bf16.xpose.msra.mxu1 %v1984_v33 }
 0x10f   : > { %1216 = vmatprep.subr.bf16.mxu0 %v1989_v34  ;;  %1257 = vmatprep.subr.bf16.mxu1 %v1992_v36 }
 0x116   : > { %1217 = vmatpush1.bf16.xpose.msra.mxu0 %v1987_v37  ;;  %1258 = vmatpush1.bf16.xpose.msra.mxu1 %v1990_v38 }
 0x117   : > { %1218 = vmatprep.subr.bf16.mxu0 %v1995_v39  ;;  %1259 = vmatprep.subr.bf16.mxu1 %v1998_v40 }
 0x11e   : > { %1219 = vmatpush1.bf16.xpose.msra.mxu0 %v1993_v41  ;;  %1260 = vmatpush1.bf16.xpose.msra.mxu1 %v1996_v42 }
 0x11f   : > { %1220 = vmatprep.subr.bf16.mxu0 %v2001_v43  ;;  %1261 = vmatprep.subr.bf16.mxu1 %v2004_v44  ;;  %v325_v44 = vld [vmem:[#allocation2] sm:$0xff] }
 0x126   : > { %1221 = vmatpush1.bf16.xpose.msra.mxu0 %v1999_v45  ;;  %1262 = vmatpush1.bf16.xpose.msra.mxu1 %v2002_v46 }
 0x127   : > { %1222 = vmatprep.subr.bf16.mxu0 %v2007_v47  ;;  %1263 = vmatprep.subr.bf16.mxu1 %v2010_v48 }
 0x12e   : > { %1223 = vmatpush2.bf16.xpose.msra.mxu0 %v2005_v49  ;;  %1264 = vmatpush2.bf16.xpose.msra.mxu1 %v2008_v50 }
 0x12f   : > { %1224 = vmatprep.subr.bf16.mxu0 %v2013_v51  ;;  %1265 = vmatprep.subr.bf16.mxu1 %v2016_v52 }
 0x136   : > { %1225 = vmatpush2.bf16.xpose.msra.mxu0 %v2011_v53  ;;  %1266 = vmatpush2.bf16.xpose.msra.mxu1 %v2014_v54 }
 0x137   : > { %1226 = vmatprep.subr.bf16.mxu0 %v2019_v55  ;;  %1267 = vmatprep.subr.bf16.mxu1 %v2022_v56 }
 0x13e   : > { %1227 = vmatpush2.bf16.xpose.msra.mxu0 %v2017_v57  ;;  %1268 = vmatpush2.bf16.xpose.msra.mxu1 %v2020_v58 }
 0x13f   : > { %1228 = vmatprep.subr.bf16.mxu0 %v2025_v59  ;;  %1269 = vmatprep.subr.bf16.mxu1 %v2028_v60 }
 0x146   : > { %1229 = vmatpush2.bf16.xpose.msra.mxu0 %v2023_v61  ;;  %1270 = vmatpush2.bf16.xpose.msra.mxu1 %v2026_v62 }
 0x147   : > { %1230 = vmatprep.subr.bf16.mxu0 %v2031_v63  ;;  %1271 = vmatprep.subr.bf16.mxu1 %v2034_v0 }
 0x14e   : > { %1231 = vmatpush2.bf16.xpose.msra.mxu0 %v2029_v1  ;;  %1272 = vmatpush2.bf16.xpose.msra.mxu1 %v2032_v2 }
 0x14f   : > { %1232 = vmatprep.subr.bf16.mxu0 %v2037_v3  ;;  %1273 = vmatprep.subr.bf16.mxu1 %v2040_v4 }
 0x156   : > { %1233 = vmatpush2.bf16.xpose.msra.mxu0 %v2035_v5  ;;  %1274 = vmatpush2.bf16.xpose.msra.mxu1 %v2038_v6 }
 0x157   : > { %1234 = vmatprep.subr.bf16.mxu0 %v2043_v7  ;;  %1275 = vmatprep.subr.bf16.mxu1 %v2046_v8 }
 0x15e   : > { %1235 = vmatpush2.bf16.xpose.msra.mxu0 %v2041_v9  ;;  %1276 = vmatpush2.bf16.xpose.msra.mxu1 %v2044_v10 }
 0x15f   : > { %1236 = vmatprep.subr.bf16.mxu0 %v2049_v11  ;;  %1277 = vmatprep.subr.bf16.mxu1 %v2052_v12 }
 0x166   : > { %1237 = vmatpush2.bf16.xpose.msra.mxu0 %v2047_v13  ;;  %1278 = vmatpush2.bf16.xpose.msra.mxu1 %v2050_v15 }
 0x16d   : > { %1239 = vmatmul.mubr.bf16.vlgmr.msra.gmra.mxu0 %v2477_v35  ;;  %1280 = vmatmul.mubr.bf16.vlgmr.msra.gmra.mxu1 %v2529_v14  ;;  %v1299_v14 = vsub.s32 %v1296_v30, %v2469_v27 }
 0x1ad   : > { %v1158_v16 = vpop.f32.mrf.mxu0  ;;  %v1199_v17 = vpop.f32.mrf.mxu1 }
 0x1ae   : > { %v1200_v18 = vadd.f32 %v1199_v17, %v1158_v16 }
 0x1af   : > { %v1160_v19 = vpop.f32.mrf.mxu0  ;;  %v1201_v20 = vpop.f32.mrf.mxu1 }
 0x1b0   : > { %v1202_v21 = vadd.f32 %v1201_v20, %v1160_v19 }
 0x1b1   : > { %v1162_v22 = vpop.f32.mrf.mxu0  ;;  %v1203_v23 = vpop.f32.mrf.mxu1 }
 0x1b2   : > { %v1292_v24 = vcombine.low %v1200_v18, %v1202_v21 }
 0x1b3   : > { %v1163_v25 = vpop.f32.mrf.mxu0  ;;  %v1204_v26 = vpop.f32.mrf.mxu1 }
 0x1b4   : > { %v1300_v42 = vrot.slane %v1292_v24, %v1299_v14 }
 0x22d   : > { %v1240_v31 = vpop.f32.mrf.mxu0  ;;  %v1281_v32 = vpop.f32.mrf.mxu1 }
 0x22e   : > { %v1282_v34 = vadd.f32 %v1281_v32, %v1240_v31 }
 0x22f   : > { %v1242_v33 = vpop.f32.mrf.mxu0  ;;  %v1283_v35 = vpop.f32.mrf.mxu1 }
 0x230   : > { %v1284_v36 = vadd.f32 %v1283_v35, %v1242_v33 }
 0x231   : > { %v1244_v37 = vpop.f32.mrf.mxu0  ;;  %v1285_v38 = vpop.f32.mrf.mxu1 }
 0x232   : > { %v1293_v39 = vcombine.low %v1282_v34, %v1284_v36 }
 0x233   : > { %v1245_v40 = vpop.f32.mrf.mxu0  ;;  %v1286_v41 = vpop.f32.mrf.mxu1 }
 0x234   : > { %v1307_v43 = vrot.slane %v1293_v39, %v1299_v14 }
 0x236   : > { %v1308_v45 = vcombine.low %v1300_v42, %v1307_v43  ;;  %1315 = sbr.rel (%p1755_p4) target bundleno = 794 (0x31a), region = 64 }
 0x238   : > { %v1310_v46 = vadd.f32 %v1308_v45, %v325_v44 }
 0x23a   : > { %1311 = vst [vmem:[#allocation2] sm:$0xff] %v1310_v46 }
 0x23b   : > { %v2053_v47 = vld [vmem:[#allocation9 + $0x4] ss:$16 sps:$4 sm:$0xff]   ;;  %v1321_v48 = vsub.s32 0, %v2469_v27  ;;  %v1325_v49 = vsub.s32 1, %v2469_v27  ;;  %v2055_v50 = vld [vmem:[#allocation9] ss:$16 sps:$4 sm:$0xff]  }
 0x23c   : > { %v1329_v51 = vsub.s32 2, %v2469_v27  ;;  %v1333_v52 = vsub.s32 3, %v2469_v27  ;;  %1426 = vmatprep.subr.bf16.mxu0 %v2053_v47  ;;  %v2056_v53 = vld [vmem:[#allocation9 + $0xc] ss:$16 sps:$4 sm:$0xff]   ;;  %v2058_v54 = vld [vmem:[#allocation9 + $0x8] ss:$16 sps:$4 sm:$0xff]  }
 0x23d   : > { %1427 = vmatpush1.bf16.xpose.msra.mxu0 %v2055_v50  ;;  %v1317_v55 = vld [vmem:[#allocation8] sm:$0xf]  ;;  %1466 = vmatprep.subr.bf16.mxu1 %v2056_v53  ;;  %v1756_v12 = vld [vmem:[%s2642_s4] ss:$0 sm:$0xff]  ;;  %vm1492_vm0 = vcmask 123904  }
 0x23e   : > { %v1322_v56 = vrot.slane %v1317_v55, %v1321_v48  ;;  %v1326_v57 = vrot.slane %v1317_v55, %v1325_v49  ;;  %v1330_v58 = vrot.slane %v1317_v55, %v1329_v51  ;;  %v1334_v59 = vrot.slane %v1317_v55, %v1333_v52  ;;  %1467 = vmatpush1.bf16.xpose.msra.mxu1 %v2058_v54 }
 0x240   : > { %v1335_v60 = vcombine.low %v1322_v56, %v1326_v57  ;;  %v1336_v61 = vcombine.low %v1330_v58, %v1334_v59 }
 0x241   : > { %v1316_v0 = vld [vmem:[#allocation2] sm:$0xff] }
 0x242   : > { %v1343_v62 = vrot.slane %v1335_v60, %v1299_v14  ;;  %v1350_v63 = vrot.slane %v1336_v61, %v1299_v14 }
 0x244   : > { %v1351_v1 = vcombine.low %v1343_v62, %v1350_v63 }
 0x246   : > { %v1353_v2 = vadd.f32 %v1351_v1, %v1316_v0 }
 0x248   : > { %v1354_v3 = vmax.f32 %v1353_v2, 0.0 }
 0x24a   : > { %v1363_v27 = vrot.slane %v1354_v3, %v1299_v14  ;;  %v1356_v4 = vcombine.high %v1354_v3, %v1354_v3 }
 0x24c   : > { %v1371_v5 = vcombine.high %v1363_v27, %v1363_v27  ;;  %v1370_v6 = vrot.slane %v1356_v4, %v1299_v14  ;;  %v1377_v7 = vpack.c.bf16 %v1363_v27, %v1363_v27 }
 0x24e   : > { %v1378_v8 = vpack.c.bf16 %v1371_v5, %v1371_v5  ;;  %v1372_v9 = vcombine.high %v1370_v6, %v1370_v6  ;;  %v1379_v10 = vpack.c.bf16 %v1370_v6, %v1370_v6 }
 0x250   : > { %1444 = vmatprep.mubr.bf16.mxu0 %v1378_v8  ;;  %v1380_v11 = vpack.c.bf16 %v1372_v9, %v1372_v9 }
 0x251   : > { %1445 = vmatmul.mubr.bf16.vlgmr.msra.gmra.mxu0 %v1377_v7 }
 0x252   : > { %1484 = vmatprep.mubr.bf16.mxu1 %v1380_v11 }
 0x253   : > { %1485 = vmatmul.mubr.bf16.vlgmr.msra.gmra.mxu1 %v1379_v10 }
 0x311   : > { %v1446_v13 = vpop.f32.mrf.mxu0 }
 0x312   : > { %v1447_v15 = vadd.f32 %v1756_v12, %v1446_v13 }
 0x313   : > { %v1448_v16 = vpop.f32.mrf.mxu0  ;;  %v1486_v17 = vpop.f32.mrf.mxu1 }
 0x314   : > { %v1487_v18 = vadd.f32 %v1486_v17, %v1447_v15 }
 0x315   : > { %v1449_v19 = vpop.f32.mrf.mxu0  ;;  %v1488_v20 = vpop.f32.mrf.mxu1 }
 0x316   : > { %1493 = vst.msk [vmem:[#allocation11] sm:$0x3] %vm1492_vm0, %v1487_v18 }
 0x317   : > { %v1450_v21 = vpop.f32.mrf.mxu0  ;;  %v1489_v22 = vpop.f32.mrf.mxu1 }
 0x319   : > { %v1490_v23 = vpop.f32.mrf.mxu1 }
 0x31a PF: > { %p1802_p5 = scmp.eq.s32.totalorder %s2329_s24, 1  ;;  %s2269_s26 = smov [#allocation11]  }
 0x31b   : > { %s1503_s6 = sshll.u32 %s2269_s26, 4  ;;  %s1504_s6 = int_to_ptr.vmem [resolvable:$true] %s1503_s6 }
 0x31c   : > { %s2167_s8 = scalar_lea.vmem %s1504_s6, 32  ;;  %p2174_p0 = scmp.lt.s32.totalorder %s1504_s6, %s1504_s6 }
 0x31d   : > { %p2168_p8 = scmp.ne.s32.totalorder %s1504_s6, %s2167_s8  ;;  %p2175_p2 = scmp.lt.s32.totalorder %s2167_s8, %s2167_s8 }
 0x31f   : > { %p2169_p11 = pnand %p2168_p8, %p1802_p5  ;;  %p2176_p3 = por %p2175_p2, %p2174_p0 }
 0x321   : > { %p2170_p12 = pneg %p2169_p11 }
 0x323   : > { %p2177_p13 = pnand %p2176_p3, %p2170_p12 }
 0x325   : > { %2180 = shalt.err (!%p2177_p13)
}
 0x326   : > { %1780 = dma.vmem_to_hbm [thread:$0]  (%p1802_p5), %s1504_s6, 32, %s2643_s5, [#allocation5]  }
 0x327   : > { %2232 = dma.done.wait (%p1802_p5), [#allocation5], 32  }
 0x328   : > { %2234 = vsyncadd (%p1802_p5), [#allocation5], 4294967264 }
 0x329 PF: > { %s23_s23 = sadd.s32 1, %s2257_s23   ;;  %s2665_s18 = smov %s2241_s19 }
 0x32a   : > { %p20_p7 = scmp.ge.s32.totalorder %s23_s23, 4   ;;  %s2666_s19 = smov %s2245_s20 }
 0x32b   : > { %s2667_s20 = smov %s2390_s29  ;;  %s2668_s21 = smov %s2253_s22 }
 0x32c   : > { %s2669_s22 = smov %s2671_s15  ;;  %22 = sbr.rel (!%p20_p7) target bundleno = 11 (0xb), region = 107 }
 0x331   :  { %1516 = vsyncpa [#allocation4], 1 }
 0x332   :  { %1518 = vsyncpa [#allocation4 + $0x1], 1 }
 0x333   :  { %1519 = vsyncpa [#allocation7], 1 }
 0x334   :  { %1521 = vsyncpa [#allocation7 + $0x1], 1 }
 0x335   :  { %1522 = vsyncpa [#allocation10], 1 }
 0x336   :  { %1523 = vsyncpa [#allocation5], 1 }
 0x337   :  { %1525 = vsyncpa [#allocation5 + $0x1], 1 }

</bundles_post_ra>
